<compile_context>
chip_gen: v7x
topology: tpu7x:2x2x1
jax: 0.10.0
libtpu: 0.0.40
codegen_flags: <defaults>
</compile_context>

<pallas_src>
import functools

import jax
import jax.numpy as jnp
from jax import lax
from jax.experimental import pallas as pl
from jax.experimental.pallas import tpu as pltpu

EPS = 1e-5  # PyTorch BatchNorm1d default


# ---------------------------------------------------------------------------
# Kernels
# ---------------------------------------------------------------------------

def _gram_kernel(x_ref, g_ref, s_ref):
    """Accumulate G += X X^T and s += X 1 over all (batch, L-tile) grid steps."""
    first = jnp.logical_and(pl.program_id(0) == 0, pl.program_id(1) == 0)

    @pl.when(first)
    def _():
        g_ref[...] = jnp.zeros_like(g_ref)
        s_ref[...] = jnp.zeros_like(s_ref)

    x = x_ref[...]                                          # (Cin, Lt)
    g_ref[...] += lax.dot_general(x, x, (((1,), (1,)), ((), ())),
                                  preferred_element_type=jnp.float32)
    s_ref[...] += jnp.sum(x, axis=-1, keepdims=True)


def _h_gram_kernel(x_ref, w21a_ref, b1_ref, g_ref, s_ref):
    """h = relu(W21a @ x + b1) per tile; accumulate Gram/sum of h."""
    first = jnp.logical_and(pl.program_id(0) == 0, pl.program_id(1) == 0)

    @pl.when(first)
    def _():
        g_ref[...] = jnp.zeros_like(g_ref)
        s_ref[...] = jnp.zeros_like(s_ref)

    x = x_ref[...]                                          # (Cin, Lt)
    h = jnp.maximum(
        jnp.dot(w21a_ref[...], x, preferred_element_type=jnp.float32) + b1_ref[...],
        0.0)                                                # (Cin, Lt)
    g_ref[...] += lax.dot_general(h, h, (((1,), (1,)), ((), ())),
                                  preferred_element_type=jnp.float32)
    s_ref[...] += jnp.sum(h, axis=-1, keepdims=True)


def _final_kernel(x_ref, w21a_ref, b1_ref, w22h_ref, w22x_ref, bshift_ref, o_ref):
    """out = relu(W22h @ h + W22x @ x + bshift) with h recomputed per tile."""
    x = x_ref[...]                                          # (Cin, Lt)
    h = jnp.maximum(
        jnp.dot(w21a_ref[...], x, preferred_element_type=jnp.float32) + b1_ref[...],
        0.0)
    y = (jnp.dot(w22h_ref[...], h, preferred_element_type=jnp.float32)
         + jnp.dot(w22x_ref[...], x, preferred_element_type=jnp.float32)
         + bshift_ref[...])
    o_ref[...] = jnp.maximum(y, 0.0).astype(o_ref.dtype)    # lane-dense (Cout, Lt) store


# ---------------------------------------------------------------------------
# Wrapper
# ---------------------------------------------------------------------------

def _choose_l_tile(L):
    for t in (512, 256, 128):
        if L % t == 0:
            return t
    return L  # full-length block (block dim == full array dim is always legal)


def _wx_stats(W, G, s, n):
    """Per-channel (mean, var) of W @ X given summed G = X X^T and s = X 1."""
    mean = (W @ s) / n                                       # (C, 1)
    ey2 = jnp.sum((W @ G) * W, axis=1, keepdims=True) / n    # diag(W G W^T) / n
    var = jnp.maximum(ey2 - mean * mean, 0.0)
    return mean, var


@functools.partial(jax.jit, static_argnames=("l_tile",))
def residual_block_pallas(x, params, l_tile=None):
    """x: (B, Cin, L) float32; returns (B, Cout, L) float32 (PyTorch layout)."""
    B, Cin, L = x.shape
    W21 = params["w21"][:, :, 0]                             # (Cin, Cin), y = W @ x
    W22 = params["w22"][:, :, 0]                             # (Cout, Cin)
    Cout = W22.shape[0]
    g21, be21 = params["g21"], params["be21"]
    g22, be22 = params["g22"], params["be22"]
    # NOTE: conv biases b21/b22 are intentionally unused: training-mode BN subtracts
    # the per-channel batch mean, which cancels any per-channel additive constant.

    lt = l_tile if l_tile is not None else _choose_l_tile(L)
    assert L % lt == 0, "L must be divisible by the chosen L tile"
    grid = (B, L // lt)
    n = float(B * L)

    x_spec = pl.BlockSpec((None, Cin, lt), lambda b, l: (b, 0, l))

    def rep(shape):  # small replicated operand / resident accumulator output
        return pl.BlockSpec(shape, lambda b, l: (0, 0))

    acc_shapes = (jax.ShapeDtypeStruct((Cin, Cin), jnp.float32),
                  jax.ShapeDtypeStruct((Cin, 1), jnp.float32))
    acc_specs = (rep((Cin, Cin)), rep((Cin, 1)))
    reduce_params = pltpu.CompilerParams(
        dimension_semantics=("arbitrary", "arbitrary"))

    # ---- pass 1: Gram of x -> stats of conv21(x) and conv22(x) ------------------
    Gx, sx = pl.pallas_call(
        _gram_kernel,
        grid=grid,
        in_specs=[x_spec],
        out_specs=acc_specs,
        out_shape=acc_shapes,
        compiler_params=reduce_params,
    )(x)

    mean1, var1 = _wx_stats(W21, Gx, sx, n)                  # bn21 stats on conv21(x)
    mean2x, var2x = _wx_stats(W22, Gx, sx, n)                # bn22 stats on conv22(x)

    a1 = g21[:, None] * lax.rsqrt(var1 + EPS)                # (Cin, 1)
    b1 = be21[:, None] - a1 * mean1                          # (Cin, 1)
    W21a = a1 * W21                                          # BN21 affine folded into conv21

    # ---- pass 2: Gram of h = relu(bn21(conv21(x))) -> stats of conv22(h) --------
    Gh, sh = pl.pallas_call(
        _h_gram_kernel,
        grid=grid,
        in_specs=[x_spec, rep((Cin, Cin)), rep((Cin, 1))],
        out_specs=acc_specs,
        out_shape=acc_shapes,
        compiler_params=reduce_params,
    )(x, W21a, b1)

    mean2h, var2h = _wx_stats(W22, Gh, sh, n)

    a2h = g22[:, None] * lax.rsqrt(var2h + EPS)              # (Cout, 1)
    a2x = g22[:, None] * lax.rsqrt(var2x + EPS)
    W22h = a2h * W22                                         # BN22(h-branch) folded weight
    W22x = a2x * W22                                         # BN22(x-branch) folded weight
    bshift = (be22[:, None] - a2h * mean2h) + (be22[:, None] - a2x * mean2x)

    # ---- pass 3: fused epilogue, fully parallel over (B, L tiles) ----------------
    out = pl.pallas_call(
        _final_kernel,
        grid=grid,
        in_specs=[x_spec, rep((Cin, Cin)), rep((Cin, 1)),
                  rep((Cout, Cin)), rep((Cout, Cin)), rep((Cout, 1))],
        out_specs=pl.BlockSpec((None, Cout, lt), lambda b, l: (b, 0, l)),
        out_shape=jax.ShapeDtypeStruct((B, Cout, L), jnp.float32),
        compiler_params=pltpu.CompilerParams(
            dimension_semantics=("parallel", "parallel")),
    )(x, W21a, b1, W22h, W22x, bshift)
    return out


# ---------------------------------------------------------------------------
# Pure-JAX reference (exact PyTorch train-mode math, including the conv biases)
# ---------------------------------------------------------------------------

def residual_block_ref(x_ncl, params):
    B, Cin, L = x_ncl.shape
    W21 = params["w21"][:, :, 0]
    W22 = params["w22"][:, :, 0]
    x2d = jnp.transpose(x_ncl, (0, 2, 1)).reshape(B * L, Cin)

    def bn(y, g, b):
        m = jnp.mean(y, axis=0)
        v = jnp.mean((y - m) ** 2, axis=0)                   # biased variance (train mode)
        return (y - m) / jnp.sqrt(v + EPS) * g + b

    h = jnp.maximum(bn(x2d @ W21.T + params["b21"], params["g21"], params["be21"]), 0.0)
    y1 = bn(h @ W22.T + params["b22"], params["g22"], params["be22"])
    y2 = bn(x2d @ W22.T + params["b22"], params["g22"], params["be22"])
    out = jnp.maximum(y1 + y2, 0.0)
    return jnp.transpose(out.reshape(B, L, -1), (0, 2, 1))


# TODO(synk): training-mode BatchNorm also updates running_mean/running_var buffers as a
# side effect; that state update is not modeled (the forward output does not depend on it).

if __name__ == "__main__":
    # Small shapes consistent with the module (in_=32 -> out_=16 channels, L=256, B=2);
    # l_tile=128 exercises multi-tile accumulation on both grid axes.
    B, Cin, Cout, L = 2, 32, 16, 256

    key = jax.random.PRNGKey(0)
    ks = jax.random.split(key, 9)
    params = {
        "w21": jax.random.normal(ks[0], (Cin, Cin, 1), jnp.float32) * 0.1,
        "b21": jax.random.normal(ks[1], (Cin,), jnp.float32) * 0.1,
        "g21": 1.0 + 0.1 * jax.random.normal(ks[2], (Cin,), jnp.float32),
        "be21": 0.1 * jax.random.normal(ks[3], (Cin,), jnp.float32),
        "w22": jax.random.normal(ks[4], (Cout, Cin, 1), jnp.float32) * 0.1,
        "b22": jax.random.normal(ks[5], (Cout,), jnp.float32) * 0.1,
        "g22": 1.0 + 0.1 * jax.random.normal(ks[6], (Cout,), jnp.float32),
        "be22": 0.1 * jax.random.normal(ks[7], (Cout,), jnp.float32),
    }
    x = jax.random.normal(ks[8], (B, Cin, L), jnp.float32)

    out = residual_block_pallas(x, params, l_tile=128)
    out = jax.block_until_ready(out)

    ref = residual_block_ref(x, params)
    assert out.shape == (B, Cout, L)
    err = jnp.max(jnp.abs(out - ref))
    assert jnp.allclose(out, ref, rtol=5e-4, atol=5e-4), f"max abs diff {err}"

    print("KERNEL_OK")
</pallas_src>

<mosaic_0001>
module attributes {stable_mosaic.version = 11 : i64} {
  func.func @_gram_kernel(%arg0: i32, %arg1: i32, %arg2: memref<1x32x128xf32, #tpu.memory_space<vmem>>, %arg3: memref<32x32xf32, #tpu.memory_space<vmem>>, %arg4: memref<32x1xf32, #tpu.memory_space<vmem>>) attributes {dimension_semantics = [#tpu.dimension_semantics<arbitrary>, #tpu.dimension_semantics<arbitrary>], iteration_bounds = array<i64: 2, 2>, scalar_prefetch = 0 : i64, scratch_operands = 0 : i64, tpu.core_type = #tpu.core_type<tc>, window_params = [{transform_indices = @transform_0, window_bounds = array<i64: 1, 32, 128>}, {pipeline_mode = #tpu.pipeline_mode<synchronous>, transform_indices = @transform_1, window_bounds = array<i64: 32, 32>}, {pipeline_mode = #tpu.pipeline_mode<synchronous>, transform_indices = @transform_2, window_bounds = array<i64: 32, 1>}]} {
    %c0_i32 = arith.constant 0 : i32
    %0 = arith.cmpi eq, %arg0, %c0_i32 : i32
    %c0_i32_0 = arith.constant 0 : i32
    %1 = arith.cmpi eq, %arg1, %c0_i32_0 : i32
    %2 = arith.andi %0, %1 : i1
    %3 = arith.extui %2 : i1 to i32
    %c0_i32_1 = arith.constant 0 : i32
    %4 = arith.cmpi ne, %3, %c0_i32_1 : i32
    scf.if %4 {
      %cst_13 = arith.constant 0.000000e+00 : f32
      %16 = vector.broadcast %cst_13 : f32 to vector<32x32xf32>
      %c0_14 = arith.constant 0 : index
      %c0_15 = arith.constant 0 : index
      %17 = vector.load %arg3[%c0_14, %c0_15] : memref<32x32xf32, #tpu.memory_space<vmem>>, vector<32x32xf32>
      tpu.vector_store %arg3[%c0_14, %c0_15], %16 {strides = array<i32>} : memref<32x32xf32, #tpu.memory_space<vmem>>, vector<32x32xf32>,
      %cst_16 = arith.constant 0.000000e+00 : f32
      %18 = vector.broadcast %cst_16 : f32 to vector<32x1xf32>
      %c0_17 = arith.constant 0 : index
      %c0_18 = arith.constant 0 : index
      %19 = vector.load %arg4[%c0_17, %c0_18] : memref<32x1xf32, #tpu.memory_space<vmem>>, vector<32x1xf32>
      tpu.vector_store %arg4[%c0_17, %c0_18], %18 {strides = array<i32>} : memref<32x1xf32, #tpu.memory_space<vmem>>, vector<32x1xf32>,
    } else {
    }
    %c0 = arith.constant 0 : index
    %c0_2 = arith.constant 0 : index
    %c0_3 = arith.constant 0 : index
    %5 = vector.load %arg2[%c0, %c0_2, %c0_3] : memref<1x32x128xf32, #tpu.memory_space<vmem>>, vector<1x32x128xf32>
    %6 = vector.shape_cast %5 : vector<1x32x128xf32> to vector<32x128xf32>
    %c0_4 = arith.constant 0 : index
    %c0_5 = arith.constant 0 : index
    %7 = vector.load %arg3[%c0_4, %c0_5] : memref<32x32xf32, #tpu.memory_space<vmem>>, vector<32x32xf32>
    %cst = arith.constant dense<0.000000e+00> : vector<32x32xf32>
    %8 = tpu.matmul %6, %6, %cst {dimension_numbers = #tpu.dot_dimension_numbers<[1], [1], [0], [0], [0, 0, 1, 0], [], []>} : vector<32x128xf32>, vector<32x128xf32>, vector<32x32xf32> -> vector<32x32xf32>
    %9 = arith.addf %7, %8 : vector<32x32xf32>
    %c0_6 = arith.constant 0 : index
    %c0_7 = arith.constant 0 : index
    %10 = vector.load %arg3[%c0_6, %c0_7] : memref<32x32xf32, #tpu.memory_space<vmem>>, vector<32x32xf32>
    tpu.vector_store %arg3[%c0_6, %c0_7], %9 {strides = array<i32>} : memref<32x32xf32, #tpu.memory_space<vmem>>, vector<32x32xf32>,
    %c0_8 = arith.constant 0 : index
    %c0_9 = arith.constant 0 : index
    %11 = vector.load %arg4[%c0_8, %c0_9] : memref<32x1xf32, #tpu.memory_space<vmem>>, vector<32x1xf32>
    %cst_10 = arith.constant dense<0.000000e+00> : vector<32xf32>
    %12 = vector.multi_reduction <add>, %6, %cst_10 [1] : vector<32x128xf32> to vector<32xf32>
    %13 = vector.shape_cast %12 : vector<32xf32> to vector<32x1xf32>
    %14 = arith.addf %11, %13 : vector<32x1xf32>
    %c0_11 = arith.constant 0 : index
    %c0_12 = arith.constant 0 : index
    %15 = vector.load %arg4[%c0_11, %c0_12] : memref<32x1xf32, #tpu.memory_space<vmem>>, vector<32x1xf32>
    tpu.vector_store %arg4[%c0_11, %c0_12], %14 {strides = array<i32>} : memref<32x1xf32, #tpu.memory_space<vmem>>, vector<32x1xf32>,
    return
  }
  func.func @transform_0(%arg0: i32, %arg1: i32) -> (i32, i32, i32) {
    %c0_i32 = arith.constant 0 : i32
    %c0_i32_0 = arith.constant 0 : i32
    return %arg0, %c0_i32, %arg1 : i32, i32, i32
  }
  func.func @transform_1(%arg0: i32, %arg1: i32) -> (i32, i32) {
    %c0_i32 = arith.constant 0 : i32
    %c0_i32_0 = arith.constant 0 : i32
    %c0_i32_1 = arith.constant 0 : i32
    return %c0_i32, %c0_i32_0 : i32, i32
  }
  func.func @transform_2(%arg0: i32, %arg1: i32) -> (i32, i32) {
    %c0_i32 = arith.constant 0 : i32
    %c0_i32_0 = arith.constant 0 : i32
    %c0_i32_1 = arith.constant 0 : i32
    return %c0_i32, %c0_i32_0 : i32, i32
  }
}

module attributes {stable_mosaic.version = 11 : i64} {
  func.func @_h_gram_kernel(%arg0: i32, %arg1: i32, %arg2: memref<1x32x128xf32, #tpu.memory_space<vmem>>, %arg3: memref<32x32xf32, #tpu.memory_space<vmem>>, %arg4: memref<32x1xf32, #tpu.memory_space<vmem>>, %arg5: memref<32x32xf32, #tpu.memory_space<vmem>>, %arg6: memref<32x1xf32, #tpu.memory_space<vmem>>) attributes {dimension_semantics = [#tpu.dimension_semantics<arbitrary>, #tpu.dimension_semantics<arbitrary>], iteration_bounds = array<i64: 2, 2>, scalar_prefetch = 0 : i64, scratch_operands = 0 : i64, tpu.core_type = #tpu.core_type<tc>, window_params = [{transform_indices = @transform_0, window_bounds = array<i64: 1, 32, 128>}, {pipeline_mode = #tpu.pipeline_mode<synchronous>, transform_indices = @transform_1, window_bounds = array<i64: 32, 32>}, {pipeline_mode = #tpu.pipeline_mode<synchronous>, transform_indices = @transform_2, window_bounds = array<i64: 32, 1>}, {pipeline_mode = #tpu.pipeline_mode<synchronous>, transform_indices = @transform_3, window_bounds = array<i64: 32, 32>}, {pipeline_mode = #tpu.pipeline_mode<synchronous>, transform_indices = @transform_4, window_bounds = array<i64: 32, 1>}]} {
    %c0_i32 = arith.constant 0 : i32
    %0 = arith.cmpi eq, %arg0, %c0_i32 : i32
    %c0_i32_0 = arith.constant 0 : i32
    %1 = arith.cmpi eq, %arg1, %c0_i32_0 : i32
    %2 = arith.andi %0, %1 : i1
    %3 = arith.extui %2 : i1 to i32
    %c0_i32_1 = arith.constant 0 : i32
    %4 = arith.cmpi ne, %3, %c0_i32_1 : i32
    scf.if %4 {
      %cst_19 = arith.constant 0.000000e+00 : f32
      %23 = vector.broadcast %cst_19 : f32 to vector<32x32xf32>
      %c0_20 = arith.constant 0 : index
      %c0_21 = arith.constant 0 : index
      %24 = vector.load %arg5[%c0_20, %c0_21] : memref<32x32xf32, #tpu.memory_space<vmem>>, vector<32x32xf32>
      tpu.vector_store %arg5[%c0_20, %c0_21], %23 {strides = array<i32>} : memref<32x32xf32, #tpu.memory_space<vmem>>, vector<32x32xf32>,
      %cst_22 = arith.constant 0.000000e+00 : f32
      %25 = vector.broadcast %cst_22 : f32 to vector<32x1xf32>
      %c0_23 = arith.constant 0 : index
      %c0_24 = arith.constant 0 : index
      %26 = vector.load %arg6[%c0_23, %c0_24] : memref<32x1xf32, #tpu.memory_space<vmem>>, vector<32x1xf32>
      tpu.vector_store %arg6[%c0_23, %c0_24], %25 {strides = array<i32>} : memref<32x1xf32, #tpu.memory_space<vmem>>, vector<32x1xf32>,
    } else {
    }
    %c0 = arith.constant 0 : index
    %c0_2 = arith.constant 0 : index
    %c0_3 = arith.constant 0 : index
    %5 = vector.load %arg2[%c0, %c0_2, %c0_3] : memref<1x32x128xf32, #tpu.memory_space<vmem>>, vector<1x32x128xf32>
    %6 = vector.shape_cast %5 : vector<1x32x128xf32> to vector<32x128xf32>
    %c0_4 = arith.constant 0 : index
    %c0_5 = arith.constant 0 : index
    %7 = vector.load %arg3[%c0_4, %c0_5] : memref<32x32xf32, #tpu.memory_space<vmem>>, vector<32x32xf32>
    %cst = arith.constant dense<0.000000e+00> : vector<32x128xf32>
    %8 = tpu.matmul %7, %6, %cst {dimension_numbers = #tpu.dot_dimension_numbers<[1], [0], [0], [1], [0, 0, 1, 1], [], []>} : vector<32x32xf32>, vector<32x128xf32>, vector<32x128xf32> -> vector<32x128xf32>
    %c0_6 = arith.constant 0 : index
    %c0_7 = arith.constant 0 : index
    %9 = vector.load %arg4[%c0_6, %c0_7] : memref<32x1xf32, #tpu.memory_space<vmem>>, vector<32x1xf32>
    %10 = vector.broadcast %9 : vector<32x1xf32> to vector<32x128xf32>
    %11 = arith.addf %8, %10 : vector<32x128xf32>
    %cst_8 = arith.constant 0.000000e+00 : f32
    %12 = vector.broadcast %cst_8 : f32 to vector<32x128xf32>
    %13 = arith.maximumf %11, %12 : vector<32x128xf32>
    %c0_9 = arith.constant 0 : index
    %c0_10 = arith.constant 0 : index
    %14 = vector.load %arg5[%c0_9, %c0_10] : memref<32x32xf32, #tpu.memory_space<vmem>>, vector<32x32xf32>
    %cst_11 = arith.constant dense<0.000000e+00> : vector<32x32xf32>
    %15 = tpu.matmul %13, %13, %cst_11 {dimension_numbers = #tpu.dot_dimension_numbers<[1], [1], [0], [0], [0, 0, 1, 0], [], []>} : vector<32x128xf32>, vector<32x128xf32>, vector<32x32xf32> -> vector<32x32xf32>
    %16 = arith.addf %14, %15 : vector<32x32xf32>
    %c0_12 = arith.constant 0 : index
    %c0_13 = arith.constant 0 : index
    %17 = vector.load %arg5[%c0_12, %c0_13] : memref<32x32xf32, #tpu.memory_space<vmem>>, vector<32x32xf32>
    tpu.vector_store %arg5[%c0_12, %c0_13], %16 {strides = array<i32>} : memref<32x32xf32, #tpu.memory_space<vmem>>, vector<32x32xf32>,
    %c0_14 = arith.constant 0 : index
    %c0_15 = arith.constant 0 : index
    %18 = vector.load %arg6[%c0_14, %c0_15] : memref<32x1xf32, #tpu.memory_space<vmem>>, vector<32x1xf32>
    %cst_16 = arith.constant dense<0.000000e+00> : vector<32xf32>
    %19 = vector.multi_reduction <add>, %13, %cst_16 [1] : vector<32x128xf32> to vector<32xf32>
    %20 = vector.shape_cast %19 : vector<32xf32> to vector<32x1xf32>
    %21 = arith.addf %18, %20 : vector<32x1xf32>
    %c0_17 = arith.constant 0 : index
    %c0_18 = arith.constant 0 : index
    %22 = vector.load %arg6[%c0_17, %c0_18] : memref<32x1xf32, #tpu.memory_space<vmem>>, vector<32x1xf32>
    tpu.vector_store %arg6[%c0_17, %c0_18], %21 {strides = array<i32>} : memref<32x1xf32, #tpu.memory_space<vmem>>, vector<32x1xf32>,
    return
  }
  func.func @transform_0(%arg0: i32, %arg1: i32) -> (i32, i32, i32) {
    %c0_i32 = arith.constant 0 : i32
    %c0_i32_0 = arith.constant 0 : i32
    return %arg0, %c0_i32, %arg1 : i32, i32, i32
  }
  func.func @transform_1(%arg0: i32, %arg1: i32) -> (i32, i32) {
    %c0_i32 = arith.constant 0 : i32
    %c0_i32_0 = arith.constant 0 : i32
    %c0_i32_1 = arith.constant 0 : i32
    return %c0_i32, %c0_i32_0 : i32, i32
  }
  func.func @transform_2(%arg0: i32, %arg1: i32) -> (i32, i32) {
    %c0_i32 = arith.constant 0 : i32
    %c0_i32_0 = arith.constant 0 : i32
    %c0_i32_1 = arith.constant 0 : i32
    return %c0_i32, %c0_i32_0 : i32, i32
  }
  func.func @transform_3(%arg0: i32, %arg1: i32) -> (i32, i32) {
    %c0_i32 = arith.constant 0 : i32
    %c0_i32_0 = arith.constant 0 : i32
    %c0_i32_1 = arith.constant 0 : i32
    return %c0_i32, %c0_i32_0 : i32, i32
  }
  func.func @transform_4(%arg0: i32, %arg1: i32) -> (i32, i32) {
    %c0_i32 = arith.constant 0 : i32
    %c0_i32_0 = arith.constant 0 : i32
    %c0_i32_1 = arith.constant 0 : i32
    return %c0_i32, %c0_i32_0 : i32, i32
  }
}

module attributes {stable_mosaic.version = 11 : i64} {
  func.func @_final_kernel(%arg0: i32, %arg1: i32, %arg2: memref<1x32x128xf32, #tpu.memory_space<vmem>>, %arg3: memref<32x32xf32, #tpu.memory_space<vmem>>, %arg4: memref<32x1xf32, #tpu.memory_space<vmem>>, %arg5: memref<16x32xf32, #tpu.memory_space<vmem>>, %arg6: memref<16x32xf32, #tpu.memory_space<vmem>>, %arg7: memref<16x1xf32, #tpu.memory_space<vmem>>, %arg8: memref<1x16x128xf32, #tpu.memory_space<vmem>>) attributes {dimension_semantics = [#tpu.dimension_semantics<parallel>, #tpu.dimension_semantics<parallel>], iteration_bounds = array<i64: 2, 2>, scalar_prefetch = 0 : i64, scratch_operands = 0 : i64, tpu.core_type = #tpu.core_type<tc>, window_params = [{transform_indices = @transform_0, window_bounds = array<i64: 1, 32, 128>}, {pipeline_mode = #tpu.pipeline_mode<synchronous>, transform_indices = @transform_1, window_bounds = array<i64: 32, 32>}, {pipeline_mode = #tpu.pipeline_mode<synchronous>, transform_indices = @transform_2, window_bounds = array<i64: 32, 1>}, {pipeline_mode = #tpu.pipeline_mode<synchronous>, transform_indices = @transform_3, window_bounds = array<i64: 16, 32>}, {pipeline_mode = #tpu.pipeline_mode<synchronous>, transform_indices = @transform_4, window_bounds = array<i64: 16, 32>}, {pipeline_mode = #tpu.pipeline_mode<synchronous>, transform_indices = @transform_5, window_bounds = array<i64: 16, 1>}, {transform_indices = @transform_6, window_bounds = array<i64: 1, 16, 128>}]} {
    %c0 = arith.constant 0 : index
    %c0_0 = arith.constant 0 : index
    %c0_1 = arith.constant 0 : index
    %0 = vector.load %arg2[%c0, %c0_0, %c0_1] : memref<1x32x128xf32, #tpu.memory_space<vmem>>, vector<1x32x128xf32>
    %1 = vector.shape_cast %0 : vector<1x32x128xf32> to vector<32x128xf32>
    %c0_2 = arith.constant 0 : index
    %c0_3 = arith.constant 0 : index
    %2 = vector.load %arg3[%c0_2, %c0_3] : memref<32x32xf32, #tpu.memory_space<vmem>>, vector<32x32xf32>
    %cst = arith.constant dense<0.000000e+00> : vector<32x128xf32>
    %3 = tpu.matmul %2, %1, %cst {dimension_numbers = #tpu.dot_dimension_numbers<[1], [0], [0], [1], [0, 0, 1, 1], [], []>} : vector<32x32xf32>, vector<32x128xf32>, vector<32x128xf32> -> vector<32x128xf32>
    %c0_4 = arith.constant 0 : index
    %c0_5 = arith.constant 0 : index
    %4 = vector.load %arg4[%c0_4, %c0_5] : memref<32x1xf32, #tpu.memory_space<vmem>>, vector<32x1xf32>
    %5 = vector.broadcast %4 : vector<32x1xf32> to vector<32x128xf32>
    %6 = arith.addf %3, %5 : vector<32x128xf32>
    %cst_6 = arith.constant 0.000000e+00 : f32
    %7 = vector.broadcast %cst_6 : f32 to vector<32x128xf32>
    %8 = arith.maximumf %6, %7 : vector<32x128xf32>
    %c0_7 = arith.constant 0 : index
    %c0_8 = arith.constant 0 : index
    %9 = vector.load %arg5[%c0_7, %c0_8] : memref<16x32xf32, #tpu.memory_space<vmem>>, vector<16x32xf32>
    %cst_9 = arith.constant dense<0.000000e+00> : vector<16x128xf32>
    %10 = tpu.matmul %9, %8, %cst_9 {dimension_numbers = #tpu.dot_dimension_numbers<[1], [0], [0], [1], [0, 0, 1, 1], [], []>} : vector<16x32xf32>, vector<32x128xf32>, vector<16x128xf32> -> vector<16x128xf32>
    %c0_10 = arith.constant 0 : index
    %c0_11 = arith.constant 0 : index
    %11 = vector.load %arg6[%c0_10, %c0_11] : memref<16x32xf32, #tpu.memory_space<vmem>>, vector<16x32xf32>
    %cst_12 = arith.constant dense<0.000000e+00> : vector<16x128xf32>
    %12 = tpu.matmul %11, %1, %cst_12 {dimension_numbers = #tpu.dot_dimension_numbers<[1], [0], [0], [1], [0, 0, 1, 1], [], []>} : vector<16x32xf32>, vector<32x128xf32>, vector<16x128xf32> -> vector<16x128xf32>
    %13 = arith.addf %10, %12 : vector<16x128xf32>
    %c0_13 = arith.constant 0 : index
    %c0_14 = arith.constant 0 : index
    %14 = vector.load %arg7[%c0_13, %c0_14] : memref<16x1xf32, #tpu.memory_space<vmem>>, vector<16x1xf32>
    %15 = vector.broadcast %14 : vector<16x1xf32> to vector<16x128xf32>
    %16 = arith.addf %13, %15 : vector<16x128xf32>
    %cst_15 = arith.constant 0.000000e+00 : f32
    %17 = vector.broadcast %cst_15 : f32 to vector<16x128xf32>
    %18 = arith.maximumf %16, %17 : vector<16x128xf32>
    %c0_16 = arith.constant 0 : index
    %c0_17 = arith.constant 0 : index
    %c0_18 = arith.constant 0 : index
    %19 = vector.load %arg8[%c0_16, %c0_17, %c0_18] : memref<1x16x128xf32, #tpu.memory_space<vmem>>, vector<1x16x128xf32>
    %20 = vector.shape_cast %19 : vector<1x16x128xf32> to vector<16x128xf32>
    %21 = vector.shape_cast %18 : vector<16x128xf32> to vector<1x16x128xf32>
    tpu.vector_store %arg8[%c0_16, %c0_17, %c0_18], %21 {strides = array<i32>} : memref<1x16x128xf32, #tpu.memory_space<vmem>>, vector<1x16x128xf32>,
    return
  }
  func.func @transform_0(%arg0: i32, %arg1: i32) -> (i32, i32, i32) {
    %c0_i32 = arith.constant 0 : i32
    %c0_i32_0 = arith.constant 0 : i32
    return %arg0, %c0_i32, %arg1 : i32, i32, i32
  }
  func.func @transform_1(%arg0: i32, %arg1: i32) -> (i32, i32) {
    %c0_i32 = arith.constant 0 : i32
    %c0_i32_0 = arith.constant 0 : i32
    %c0_i32_1 = arith.constant 0 : i32
    return %c0_i32, %c0_i32_0 : i32, i32
  }
  func.func @transform_2(%arg0: i32, %arg1: i32) -> (i32, i32) {
    %c0_i32 = arith.constant 0 : i32
    %c0_i32_0 = arith.constant 0 : i32
    %c0_i32_1 = arith.constant 0 : i32
    return %c0_i32, %c0_i32_0 : i32, i32
  }
  func.func @transform_3(%arg0: i32, %arg1: i32) -> (i32, i32) {
    %c0_i32 = arith.constant 0 : i32
    %c0_i32_0 = arith.constant 0 : i32
    %c0_i32_1 = arith.constant 0 : i32
    return %c0_i32, %c0_i32_0 : i32, i32
  }
  func.func @transform_4(%arg0: i32, %arg1: i32) -> (i32, i32) {
    %c0_i32 = arith.constant 0 : i32
    %c0_i32_0 = arith.constant 0 : i32
    %c0_i32_1 = arith.constant 0 : i32
    return %c0_i32, %c0_i32_0 : i32, i32
  }
  func.func @transform_5(%arg0: i32, %arg1: i32) -> (i32, i32) {
    %c0_i32 = arith.constant 0 : i32
    %c0_i32_0 = arith.constant 0 : i32
    %c0_i32_1 = arith.constant 0 : i32
    return %c0_i32, %c0_i32_0 : i32, i32
  }
  func.func @transform_6(%arg0: i32, %arg1: i32) -> (i32, i32, i32) {
    %c0_i32 = arith.constant 0 : i32
    %c0_i32_0 = arith.constant 0 : i32
    return %arg0, %c0_i32, %arg1 : i32, i32, i32
  }
}

</mosaic_0001>

<bundles_post_ra>
// kernel: residual_block_pallas.3
= control target key start
LH: loop header
LB: loop body
LE: loop exit
PB: predicated region body
PF: predicated region fallthrough
CT: control target
= control target key end

     0   :  { %8 = vsyncpa [#allocation3], 0  ;;  %s817_s0 = inlined_call_operand.hbm [shape: f32[2,32,256], index: 0, kind: input, shape index: {}]   ;;  %s818_s1 = inlined_call_operand.vmem [shape: f32[32,32], index: 1, kind: output, shape index: {0}]   ;;  %s819_s2 = inlined_call_operand.vmem [shape: f32[32,1], index: 2, kind: output, shape index: {1}]  }
   0x1   :  { %10 = vsyncpa [#allocation3 + $0x1], 0  ;;  %s597_s9 = smov 0   ;;  %s599_s10 = smov 0  }
   0x2   :  { %s601_s11 = smov 0   ;;  %s603_s12 = smov 0  }
   0x3   :  { %s605_s13 = smov 0   ;;  %s607_s14 = smov 0  }
   0x4   :  { %s609_s15 = smov 0   ;;  %s611_s16 = smov 0  }
   0x5 LB: > { %s360_s17 = sadd.s32 4294967295, %s575_s16   ;;  %s25_s18 = sadd.s32 1, %s567_s14  ;;  %s575_s16 = sphi %s611_s16, %s16_s16   ;;  %s571_s15 = sphi %s609_s15, %s830_s15   ;;  %s567_s14 = sphi %s607_s14, %s829_s14   ;;  %s563_s13 = sphi %s605_s13, %s828_s13   ;;  %s559_s12 = sphi %s603_s12, %s827_s12   ;;  %s555_s11 = sphi %s601_s11, %s826_s11   ;;  %s551_s10 = sphi %s599_s10, %s825_s10   ;;  %s547_s9 = sphi %s597_s9, %s824_s9  }
   0x6   : > { %p26_p0 = scmp.ge.s32.totalorder %s25_s18, 2  ;;  %s28_s19 = sadd.s32 1, %s571_s15 }
   0x7   : > { %s37_s20 = sadd.s32 1, %s555_s11  ;;  %p44_p1 = scmp.ne.s32.totalorder %s555_s11, %s551_s10 }
   0x8   : > { %s832_s18 = smov (%p26_p0, %s25_s18), 0  ;;  %s834_s19 = smov (!%p26_p0, %s28_s19), %s571_s15 }
   0x9   : > { %s33_s21 = ssub.s32 %s567_s14, %s832_s18  ;;  %p45_p2 = scmp.eq.s32.totalorder %s575_s16, 0 }
   0xa   : > { %p30_p3 = scmp.ge.s32.totalorder %s834_s19, 2  ;;  %p50_p4 = scmp.ne.s32.totalorder %s551_s10, %s547_s9 }
   0xb   : > { %p648_p5 = por %p45_p2, %p44_p1  ;;  %p51_p6 = scmp.eq.s32.totalorder %s360_s17, 0 }
   0xc   : > { %s836_s19 = smov (%p30_p3, %s834_s19), 0  ;;  %p410_p8 = scmp.lt.s32.totalorder %s575_s16, 4 }
   0xd   : > { %p654_p7 = por %p51_p6, %p50_p4  ;;  %s32_s24 = ssub.s32 %s571_s15, %s836_s19 }
   0xe   : > { %s34_s25 = sor.u32 %s33_s21, %s32_s24  ;;  %s116_s26 = sand.u32 1, %s555_s11  }
   0xf   : > { %p35_p9 = scmp.eq.s32.totalorder %s34_s25, 0  ;;  %s363_s27 = sshll.u32 %s116_s26, 5 }
  0x10   : > { %s364_s28 = sshll.u32 %s571_s15, 3  ;;  %s120_s4 = scalar_lea.vmem [#allocation2], %s363_s27 }
  0x11   : > { %s664_s29 = scalar_select %p35_p9, %s555_s11, %s37_s20  }
  0x12   : > { %s125_s30 = sadd.s32 %s567_s14, %s364_s28  ;;  %s128_s5 = sshll.u32 %s120_s4, 4  ;;  %s672_s5 = int_to_ptr.vmem [resolvable:$true] %s128_s5 }
  0x13   : > { %s365_s3 = sshll.u32 %s125_s30, 7  ;;  %p678_p10 = pnand %p410_p8, %p648_p5 }
  0x14   : > { %s670_s8 = scalar_lea.hbm %s817_s0, %s365_s3  ;;  %s683_s17 = scalar_lea.sflag [#allocation3], %s116_s26 }
  0x15   : > { %s479_s20 = scalar_lea.hbm %s670_s8, 512  ;;  %p481_p13 = pneg %p678_p10 }
  0x16   : > { %p480_p12 = scmp.ne.s32.totalorder %s670_s8, %s479_s20  ;;  %s484_s24 = scalar_lea.hbm %s817_s0, 2048 }
  0x17   : > { %p485_p2 = scmp.lt.u32.totalorder %s670_s8, %s817_s0  ;;  %p486_p3 = scmp.lt.u32.totalorder %s484_s24, %s479_s20 }
  0x18   : > { %p482_p0 = pnand %p481_p13, %p480_p12  ;;  %p488_p5 = scmp.lt.u32.totalorder %s479_s20, %s670_s8 }
  0x19   : > { %p487_p4 = por %p486_p3, %p485_p2 }
  0x1a   : > { %p483_p1 = pneg %p482_p0 }
  0x1b   : > { %p489_p6 = por %p488_p5, %p487_p4 }
  0x1d   : > { %p490_p8 = pnand %p489_p6, %p483_p1 }
  0x1f   : > { %493 = shalt.err (!%p490_p8)
}
  0x20   : > { %s494_s26 = scalar_lea.vmem %s672_s5, 512  ;;  %s577_s28 = smov [#allocation2]  }
  0x21   : > { %p495_p9 = scmp.ne.s32.totalorder %s672_s5, %s494_s26  ;;  %s499_s30 = sshll.u32 %s577_s28, 4  ;;  %s500_s30 = int_to_ptr.vmem [resolvable:$false] %s499_s30 }
  0x22   : > { %s501_s3 = scalar_lea.vmem %s500_s30, 1024  ;;  %p502_p11 = scmp.lt.s32.totalorder %s672_s5, %s500_s30 }
  0x23   : > { %p497_p12 = pnand %p495_p9, %p481_p13  ;;  %p503_p2 = scmp.lt.s32.totalorder %s501_s3, %s494_s26 }
  0x25   : > { %p498_p0 = pneg %p497_p12  ;;  %p504_p3 = por %p503_p2, %p502_p11 }
  0x27   : > { %p505_p4 = pnand %p504_p3, %p498_p0 }
  0x29   : > { %508 = shalt.err (!%p505_p4)
}
  0x2a   : > { %s578_s4 = smov 256   ;;  %s579_s6 = smov 128  }
  0x2b   : > { %s580_s7 = smov 8   ;;  %p136_p13 = scmp.lt.s32.totalorder %s575_s16, 5 }
  0x2c   : > { %409 = dma.hbm_to_vmem [thread:$0]  (!%p678_p10), %s670_s8, 512, %s672_s5, %s683_s17, %s578_s4, %s579_s6, %s580_s7  }
  0x2d   : > { %p823_p1 = scmp.ge.s32.totalorder %s575_s16, 1 }
  0x2f   : > { %p137_p5 = pnand %p823_p1, %p136_p13 }
  0x30   : > { %s142_s20 = sand.u32 (!%p137_p5), 1, %s551_s10  }
  0x31   : > { %140 = sbr.rel (%p137_p5) target bundleno = 303 (0x12f), region = 24  ;;  %s367_s21 = sshll.u32 (!%p137_p5), %s142_s20, 5 }
  0x32   : > { %s143_s22 = scalar_lea.sflag (!%p137_p5), [#allocation3], %s142_s20  ;;  %s146_s24 = scalar_lea.vmem (!%p137_p5), [#allocation2], %s367_s21 }
  0x38   : > { %542 = dma.done.wait (%p654_p7), %s143_s22, 512  }
  0x39   : > { %544 = vsyncadd (%p654_p7), %s143_s22, 4294966784  ;;  %p162_p11 = scmp.eq.s32.totalorder %s563_s13, 0  ;;  %p163_p6 = scmp.eq.s32.totalorder %s559_s12, 0 }
  0x3b   : > { %p164_p10 = pnand %p163_p6, %p162_p11 }
  0x3c   : > { %vm168_vm0 = vcmask (!%p164_p10), 261120   ;;  %vm173_vm1 = vcmask (!%p164_p10), 7168   ;;  %v581_v0 = vmov (!%p164_p10), 0.0  }
  0x3d   : > { %167 = sbr.rel (%p164_p10) target bundleno = 68 (0x44), region = 32  ;;  %169 = vst.msk [vmem:[%s818_s1] sm:$0xff] (!%p164_p10), %vm168_vm0, %v581_v0  ;;  %170 = vst.msk [vmem:[%s818_s1 + $0x8] sm:$0xff] (!%p164_p10), %vm168_vm0, %v581_v0 }
  0x3e   : > { %171 = vst.msk [vmem:[%s818_s1 + $0x10] sm:$0xff] (!%p164_p10), %vm168_vm0, %v581_v0  ;;  %172 = vst.msk [vmem:[%s818_s1 + $0x18] sm:$0xff] (!%p164_p10), %vm168_vm0, %v581_v0 }
  0x3f   : > { %174 = vst.msk [vmem:[%s819_s2] sm:$0xff] (!%p164_p10), %vm173_vm1, %v581_v0  ;;  %175 = vst.msk [vmem:[%s819_s2 + $0x8] sm:$0xff] (!%p164_p10), %vm173_vm1, %v581_v0 }
  0x40   : > { %176 = vst.msk [vmem:[%s819_s2 + $0x10] sm:$0xff] (!%p164_p10), %vm173_vm1, %v581_v0  ;;  %177 = vst.msk [vmem:[%s819_s2 + $0x18] sm:$0xff] (!%p164_p10), %vm173_vm1, %v581_v0 }
  0x44 PF: > { %v178_v1 = vld [vmem:[%s146_s24] sm:$0xff]  ;;  %v179_v2 = vld [vmem:[%s146_s24 + $0x8] sm:$0xff]  ;;  %v180_v3 = vld [vmem:[%s146_s24 + $0x10] sm:$0xff]  ;;  %vm296_vm2 = vcmask 7168   ;;  %vm275_vm3 = vcmask 261120  }
  0x45   : > { %v392_v4 = vpack.c.bf16 %v179_v2, %v178_v1  ;;  %v181_v5 = vld [vmem:[%s146_s24 + $0x18] sm:$0xff]  ;;  %386 = vmatprep.mubr.f32.mxu0 %v178_v1  ;;  %389 = vmatprep.mubr.f32.mxu1 %v180_v3  ;;  %v183_v19 = vld [vmem:[%s818_s1 + $0x8] sm:$0xff]  ;;  %v182_v21 = vld [vmem:[%s818_s1] sm:$0xff] }
  0x46   : > { %v396_v6 = vpack.c.bf16 %v181_v5, %v180_v3  ;;  %288 = vadd.xlane.f32.xlu1 %v180_v3  ;;  %284 = vadd.xlane.f32.xlu0 %v178_v1  ;;  %v280_v8 = vld [vmem:[%s819_s2] sm:$0xff]  ;;  %v281_v14 = vld [vmem:[%s819_s2 + $0x8] sm:$0xff]  ;;  %v185_v20 = vld [vmem:[%s818_s1 + $0x18] sm:$0xff] }
  0x47   : > { %393 = vmatprep.subr.bf16.mxu0 %v392_v4  ;;  %400 = vmatprep.subr.bf16.mxu1 %v392_v4  ;;  %v282_v7 = vld [vmem:[%s819_s2 + $0x10] sm:$0xff]  ;;  %v283_v13 = vld [vmem:[%s819_s2 + $0x18] sm:$0xff] }
  0x48   : > { %395 = vmatpush3.bf16.xpose.msra.mxu0 %v392_v4  ;;  %402 = vmatpush3.bf16.xpose.msra.mxu1 %v392_v4  ;;  %v184_v22 = vld [vmem:[%s818_s1 + $0x10] sm:$0xff] }
  0x49   : > { %397 = vmatprep.subr.bf16.mxu0 %v396_v6  ;;  %401 = vmatprep.subr.bf16.mxu1 %v396_v6 }
  0x4a   : > { %290 = vadd.xlane.f32.xlu1 %v181_v5  ;;  %286 = vadd.xlane.f32.xlu0 %v179_v2 }
  0x50   : > { %399 = vmatpush3.bf16.xpose.msra.mxu0 %v396_v6  ;;  %403 = vmatpush3.bf16.xpose.msra.mxu1 %v396_v6 }
  0x57   : > { %387 = vmatmul.mubr.f32.vlgmr.msra.gmra.mrb[0].mxu0 %v179_v2  ;;  %390 = vmatmul.mubr.f32.vlgmr.msra.gmra.mrb[0].mxu1 %v181_v5 }
  0xd3   : > { %v289_v9 = vpop.xlane.xlu1 %288  ;;  %v285_v10 = vpop.xlane.xlu0 %284 }
  0xd4   : > { %v294_v11 = vadd.f32 %v289_v9, %v282_v7  ;;  %v292_v12 = vadd.f32 %v285_v10, %v280_v8 }
  0xd6   : > { %299 = vst.msk [vmem:[%s819_s2 + $0x10] sm:$0xff] %vm296_vm2, %v294_v11  ;;  %297 = vst.msk [vmem:[%s819_s2] sm:$0xff] %vm296_vm2, %v292_v12 }
  0xd7   : > { %v291_v15 = vpop.xlane.xlu1 %290  ;;  %v287_v16 = vpop.xlane.xlu0 %286 }
  0xd8   : > { %v295_v17 = vadd.f32 %v291_v15, %v283_v13  ;;  %v293_v18 = vadd.f32 %v287_v16, %v281_v14 }
  0xda   : > { %300 = vst.msk [vmem:[%s819_s2 + $0x18] sm:$0xff] %vm296_vm2, %v295_v17  ;;  %298 = vst.msk [vmem:[%s819_s2 + $0x8] sm:$0xff] %vm296_vm2, %v293_v18 }
 0x12a   : > { %v388_v23 = vpop.f32.mrb[0].mxu0  ;;  %v391_v24 = vpop.f32.mrb[0].mxu1 }
 0x12b   : > { %v272_v25 = vadd.f32 %v388_v23, %v183_v19  ;;  %v274_v26 = vadd.f32 %v391_v24, %v185_v20  ;;  %v252_v27 = vpop.f32.mrb[1].mxu0  ;;  %v262_v28 = vpop.f32.mrb[1].mxu1 }
 0x12c   : > { %v271_v29 = vadd.f32 %v252_v27, %v182_v21  ;;  %v273_v30 = vadd.f32 %v262_v28, %v184_v22 }
 0x12d   : > { %277 = vst.msk [vmem:[%s818_s1 + $0x8] sm:$0xff] %vm275_vm3, %v272_v25  ;;  %279 = vst.msk [vmem:[%s818_s1 + $0x18] sm:$0xff] %vm275_vm3, %v274_v26 }
 0x12e   : > { %276 = vst.msk [vmem:[%s818_s1] sm:$0xff] %vm275_vm3, %v271_v29  ;;  %278 = vst.msk [vmem:[%s818_s1 + $0x10] sm:$0xff] %vm275_vm3, %v273_v30 }
 0x12f PF: > { %s16_s16 = sadd.s32 1, %s575_s16   ;;  %s824_s9 = smov %s551_s10 }
 0x130   : > { %p13_p7 = scmp.ge.s32.totalorder %s16_s16, 6   ;;  %s825_s10 = smov %s555_s11 }
 0x131   : > { %s826_s11 = smov %s664_s29  ;;  %s827_s12 = smov %s567_s14 }
 0x132   : > { %s828_s13 = smov %s571_s15  ;;  %s829_s14 = smov %s832_s18 }
 0x133   : > { %s830_s15 = smov %s836_s19  ;;  %15 = sbr.rel (!%p13_p7) target bundleno = 5 (0x5), region = 72 }
 0x13a   :  { %318 = vsyncpa [#allocation3], 1 }
 0x13b   :  { %320 = vsyncpa [#allocation3 + $0x1], 1 }

// kernel: residual_block_pallas.4
= control target key start
LH: loop header
LB: loop body
LE: loop exit
PB: predicated region body
PF: predicated region fallthrough
CT: control target
= control target key end

     0   :  { %s781_s15 = smov 0   ;;  %s783_s16 = smov 0   ;;  %s971_s0 = inlined_call_operand.vmem [shape: f32[2,32,256], index: 0, kind: input, shape index: {}]   ;;  %s972_s1 = inlined_call_operand.vmem [shape: f32[32,32], index: 1, kind: input, shape index: {}]   ;;  %s973_s2 = inlined_call_operand.vmem [shape: f32[32,1], index: 2, kind: input, shape index: {}]   ;;  %s974_s3 = inlined_call_operand.vmem [shape: f32[32,32], index: 3, kind: output, shape index: {0}]   ;;  %s975_s4 = inlined_call_operand.vmem [shape: f32[32,1], index: 4, kind: output, shape index: {1}]  }
   0x1   :  { %s785_s17 = smov 0   ;;  %s787_s18 = smov 0  }
   0x2   :  { %s789_s19 = smov 0   ;;  %s791_s20 = smov 0  }
   0x3   :  { %s793_s21 = smov 0  }
   0x4 LB: > { %s24_s22 = sadd.s32 1, %s744_s19  ;;  %s27_s23 = sadd.s32 1, %s748_s20  ;;  %s752_s21 = sphi %s793_s21, %s15_s21   ;;  %s748_s20 = sphi %s791_s20, %s981_s20   ;;  %s744_s19 = sphi %s789_s19, %s980_s19   ;;  %s740_s18 = sphi %s787_s18, %s979_s18   ;;  %s736_s17 = sphi %s785_s17, %s978_s17   ;;  %s732_s16 = sphi %s783_s16, %s977_s16   ;;  %s728_s15 = sphi %s781_s15, %s976_s15  }
   0x5   : > { %p25_p0 = scmp.ge.s32.totalorder %s24_s22, 2  ;;  %p43_p1 = scmp.ne.s32.totalorder %s732_s16, %s728_s15 }
   0x6   : > { %p44_p2 = scmp.eq.s32.totalorder %s752_s21, 0  ;;  %s36_s27 = sadd.s32 1, %s732_s16 }
   0x7   : > { %s983_s22 = smov (%p25_p0, %s24_s22), 0  ;;  %s985_s23 = smov (!%p25_p0, %s27_s23), %s748_s20 }
   0x8   : > { %p45_p3 = por %p44_p2, %p43_p1  ;;  %p29_p4 = scmp.ge.s32.totalorder %s985_s23, 2 }
   0x9   : > { %s32_s24 = ssub.s32 %s744_s19, %s983_s22  ;;  %p566_p6 = scmp.ge.s32.totalorder %s752_s21, 4 }
   0xa   : > { %s987_s23 = smov (%p29_p4, %s985_s23), 0 }
   0xb   : > { %s31_s25 = ssub.s32 %s748_s20, %s987_s23  ;;  %159 = sbr.rel (%p566_p6) target bundleno = 26 (0x1a), region = 24 }
   0xc   : > { %s33_s26 = sor.u32 %s32_s24, %s31_s25 }
   0xd   : > { %p34_p5 = scmp.eq.s32.totalorder %s33_s26, 0 }
   0xf   : > { %s832_s28 = scalar_select %p34_p5, %s732_s16, %s36_s27  }
  0x12   : > { %162 = sbr.rel (!%p45_p3) target bundleno = 26 (0x1a), region = 28  ;;  %s164_s29 = sand.u32 (%p45_p3), 1, %s732_s16  }
  0x13   : > { %s568_s30 = sshll.u32 (%p45_p3), %s748_s20, 3  ;;  %s567_s5 = sshll.u32 (%p45_p3), %s164_s29, 5 }
  0x14   : > { %s168_s6 = sadd.s32 (%p45_p3), %s744_s19, %s568_s30  ;;  %s166_s11 = scalar_lea.vmem (%p45_p3), [#allocation2], %s567_s5 }
  0x15   : > { %s569_s7 = sshll.u32 (%p45_p3), %s168_s6, 3 }
  0x16   : > { %s170_s10 = scalar_lea.vmem (%p45_p3), %s971_s0, %s569_s7 }
  0x17   : > { %v204_v0 = vld [vmem:[%s170_s10] sm:$0xff] (%p45_p3)  ;;  %v206_v1 = vld [vmem:[%s170_s10 + $0x10] sm:$0xff] (%p45_p3) }
  0x18   : > { %v208_v2 = vld [vmem:[%s170_s10 + $0x20] sm:$0xff] (%p45_p3)  ;;  %205 = vst [vmem:[%s166_s11] sm:$0xff] (%p45_p3), %v204_v0  ;;  %207 = vst [vmem:[%s166_s11 + $0x8] sm:$0xff] (%p45_p3), %v206_v1  ;;  %v210_v3 = vld [vmem:[%s170_s10 + $0x30] sm:$0xff] (%p45_p3) }
  0x19   : > { %209 = vst [vmem:[%s166_s11 + $0x10] sm:$0xff] %v208_v2  ;;  %211 = vst [vmem:[%s166_s11 + $0x18] sm:$0xff] %v210_v3 }
  0x1a PF: > { %p570_p7 = scmp.ge.s32.totalorder %s752_s21, 1  ;;  %p216_p8 = scmp.lt.s32.totalorder %s752_s21, 5 }
  0x1c   : > { %p217_p9 = pnand %p570_p7, %p216_p8 }
  0x1d   : > { %s223_s12 = sand.u32 (!%p217_p9), 1, %s728_s15   ;;  %p243_p10 = scmp.eq.s32.totalorder (!%p217_p9), %s740_s18, 0 }
  0x1e   : > { %220 = sbr.rel (%p217_p9) target bundleno = 510 (0x1fe), region = 66  ;;  %s571_s13 = sshll.u32 (!%p217_p9), %s223_s12, 5 }
  0x1f   : > { %p244_p11 = scmp.eq.s32.totalorder (!%p217_p9), %s736_s17, 0  ;;  %s225_s14 = scalar_lea.vmem (!%p217_p9), [#allocation2], %s571_s13 }
  0x21   : > { %p245_p12 = pnand (!%p217_p9), %p244_p11, %p243_p10 }
  0x25   : > { %248 = sbr.rel (%p245_p12) target bundleno = 44 (0x2c), region = 74  ;;  %vm249_vm0 = vcmask (!%p245_p12), 261120   ;;  %vm254_vm1 = vcmask (!%p245_p12), 7168   ;;  %v754_v4 = vmov (!%p245_p12), 0.0  }
  0x26   : > { %250 = vst.msk [vmem:[%s974_s3] sm:$0xff] (!%p245_p12), %vm249_vm0, %v754_v4  ;;  %251 = vst.msk [vmem:[%s974_s3 + $0x8] sm:$0xff] (!%p245_p12), %vm249_vm0, %v754_v4 }
  0x27   : > { %252 = vst.msk [vmem:[%s974_s3 + $0x10] sm:$0xff] (!%p245_p12), %vm249_vm0, %v754_v4  ;;  %253 = vst.msk [vmem:[%s974_s3 + $0x18] sm:$0xff] (!%p245_p12), %vm249_vm0, %v754_v4 }
  0x28   : > { %255 = vst.msk [vmem:[%s975_s4] sm:$0xff] (!%p245_p12), %vm254_vm1, %v754_v4  ;;  %256 = vst.msk [vmem:[%s975_s4 + $0x8] sm:$0xff] (!%p245_p12), %vm254_vm1, %v754_v4 }
  0x29   : > { %257 = vst.msk [vmem:[%s975_s4 + $0x10] sm:$0xff] (!%p245_p12), %vm254_vm1, %v754_v4  ;;  %258 = vst.msk [vmem:[%s975_s4 + $0x18] sm:$0xff] (!%p245_p12), %vm254_vm1, %v754_v4 }
  0x2c PF: > { %v259_v5 = vld [vmem:[%s225_s14] sm:$0xff]  ;;  %v260_v6 = vld [vmem:[%s225_s14 + $0x8] sm:$0xff]  ;;  %v261_v7 = vld [vmem:[%s225_s14 + $0x10] sm:$0xff]  ;;  %vm291_vm2 = vcmask 261120   ;;  %v755_v11 = vmov 0   ;;  %vm506_vm3 = vcmask 7168  }
  0x2d   : > { %v622_v8 = vpack.c.bf16 %v260_v6, %v259_v5  ;;  %v262_v9 = vld [vmem:[%s225_s14 + $0x18] sm:$0xff]  ;;  %v263_v10 = vld [vmem:[%s972_s1] sm:$0xff]  ;;  %696 = vset.pattern.permute.xlu0 %v755_v11  ;;  %697 = vset.pattern.permute.xlu1 %v755_v11  ;;  %v269_v14 = vld [vmem:[%s973_s2 + $0x10] sm:$0xff] }
  0x2e   : > { %v626_v12 = vpack.c.bf16 %v262_v9, %v261_v7  ;;  %602 = vmatprep.mubr.msk.f32.mxu0 %vm291_vm2, %v263_v10  ;;  %v267_v13 = vld [vmem:[%s973_s2] sm:$0xff]  ;;  %v268_v15 = vld [vmem:[%s973_s2 + $0x8] sm:$0xff]  ;;  %283 = vperm.xlu1 %697, %v269_v14   ;;  %v270_v16 = vld [vmem:[%s973_s2 + $0x18] sm:$0xff] }
  0x2f   : > { %623 = vmatprep.subr.bf16.mxu0 %v622_v8  ;;  %273 = vperm.xlu0 %696, %v267_v13   ;;  %v264_v17 = vld [vmem:[%s972_s1 + $0x8] sm:$0xff]  ;;  %v265_v18 = vld [vmem:[%s972_s1 + $0x10] sm:$0xff]  ;;  %v266_v19 = vld [vmem:[%s972_s1 + $0x18] sm:$0xff] }
  0x30   : > { %625 = vmatpush3.bf16.msra.mxu0 %v622_v8  ;;  %v491_v38 = vld [vmem:[%s975_s4 + $0x8] sm:$0xff]  ;;  %v490_v39 = vld [vmem:[%s975_s4] sm:$0xff]  ;;  %v492_v44 = vld [vmem:[%s975_s4 + $0x10] sm:$0xff] }
  0x31   : > { %627 = vmatprep.subr.bf16.mxu0 %v626_v12  ;;  %v493_v47 = vld [vmem:[%s975_s4 + $0x18] sm:$0xff]  ;;  %v394_v50 = vld [vmem:[%s974_s3 + $0x8] sm:$0xff]  ;;  %v393_v51 = vld [vmem:[%s974_s3] sm:$0xff] }
  0x32   : > { %288 = vperm.xlu1 %697, %v270_v16   ;;  %v396_v56 = vld [vmem:[%s974_s3 + $0x18] sm:$0xff]  ;;  %v395_v57 = vld [vmem:[%s974_s3 + $0x10] sm:$0xff] }
  0x33   : > { %278 = vperm.xlu0 %696, %v268_v15  }
  0x34   : > { %629 = vmatpush3.bf16.msra.mxu0 %v626_v12 }
  0x37   : > { %603 = vmatmul.mubr.msk.f32.vlgmr.msra.gmra.mrb[0].mxu0 %vm291_vm2, %v264_v17 }
  0x38   : > { %605 = vmatprep.mubr.msk.f32.mxu0 %vm291_vm2, %v265_v18 }
  0x3b   : > { %606 = vmatmul.mubr.msk.f32.gmra.mrb[2].mxu0 %vm291_vm2, %v266_v19 }
  0xad   : > { %v284_v21 = vpop.permute.xlu1 %283 }
  0xae   : > { %v274_v20 = vpop.permute.xlu0 %273 }
  0xb1   : > { %v289_v27 = vpop.permute.xlu1 %288 }
  0xb2   : > { %v279_v22 = vpop.permute.xlu0 %278 }
 0x10a   : > { %v604_v23 = vpop.f32.mrb[0].mxu0 }
 0x10b   : > { %v376_v24 = vadd.f32 %v604_v23, %v279_v22  ;;  %v370_v25 = vpop.f32.mrb[1].mxu0 }
 0x10c   : > { %v371_v26 = vadd.f32 %v370_v25, %v274_v20 }
 0x10d   : > { %v390_v28 = vmax.f32 %v376_v24, 0.0 }
 0x10e   : > { %v389_v29 = vmax.f32 %v371_v26, 0.0  ;;  %v607_v30 = vpop.f32.mrb[2].mxu0 }
 0x10f   : > { %v386_v31 = vadd.f32 %v607_v30, %v289_v27  ;;  %496 = vadd.xlane.f32.xlu1 %v390_v28  ;;  %v380_v32 = vpop.f32.mrb[3].mxu0 }
 0x110   : > { %v381_v33 = vadd.f32 %v380_v32, %v284_v21  ;;  %494 = vadd.xlane.f32.xlu0 %v389_v29  ;;  %616 = vmatprep.mubr.f32.mxu1 %v389_v29  ;;  %v630_v34 = vpack.c.bf16 %v390_v28, %v389_v29 }
 0x111   : > { %v392_v35 = vmax.f32 %v386_v31, 0.0 }
 0x112   : > { %v391_v36 = vmax.f32 %v381_v33, 0.0  ;;  %631 = vmatprep.subr.bf16.mxu1 %v630_v34 }
 0x113   : > { %633 = vmatpush3.bf16.xpose.msra.mxu1 %v630_v34 }
 0x114   : > { %498 = vadd.xlane.f32.xlu0 %v391_v36  ;;  %v634_v37 = vpack.c.bf16 %v392_v35, %v391_v36 }
 0x116   : > { %635 = vmatprep.subr.bf16.mxu1 %v634_v37 }
 0x118   : > { %500 = vadd.xlane.f32.xlu0 %v392_v35 }
 0x11b   : > { %637 = vmatpush3.bf16.xpose.msra.mxu1 %v634_v37 }
 0x122   : > { %617 = vmatmul.mubr.f32.vlgmr.msra.gmra.mrb[0].mxu1 %v390_v28 }
 0x123   : > { %619 = vmatprep.mubr.f32.mxu1 %v391_v36 }
 0x126   : > { %620 = vmatmul.mubr.f32.gmra.mrb[2].mxu1 %v392_v35 }
 0x19c   : > { %v497_v40 = vpop.xlane.xlu1 %496 }
 0x19d   : > { %v503_v41 = vadd.f32 %v497_v40, %v491_v38  ;;  %v495_v42 = vpop.xlane.xlu0 %494 }
 0x19e   : > { %v502_v43 = vadd.f32 %v495_v42, %v490_v39 }
 0x19f   : > { %508 = vst.msk [vmem:[%s975_s4 + $0x8] sm:$0xff] %vm506_vm3, %v503_v41 }
 0x1a0   : > { %507 = vst.msk [vmem:[%s975_s4] sm:$0xff] %vm506_vm3, %v502_v43 }
 0x1a1   : > { %v499_v45 = vpop.xlane.xlu0 %498 }
 0x1a2   : > { %v504_v46 = vadd.f32 %v499_v45, %v492_v44 }
 0x1a4   : > { %509 = vst.msk [vmem:[%s975_s4 + $0x10] sm:$0xff] %vm506_vm3, %v504_v46 }
 0x1a5   : > { %v501_v48 = vpop.xlane.xlu0 %500 }
 0x1a6   : > { %v505_v49 = vadd.f32 %v501_v48, %v493_v47 }
 0x1a8   : > { %510 = vst.msk [vmem:[%s975_s4 + $0x18] sm:$0xff] %vm506_vm3, %v505_v49 }
 0x1f5   : > { %v618_v52 = vpop.f32.mrb[0].mxu1 }
 0x1f6   : > { %v483_v53 = vadd.f32 %v618_v52, %v394_v50  ;;  %v463_v54 = vpop.f32.mrb[1].mxu1 }
 0x1f7   : > { %v482_v55 = vadd.f32 %v463_v54, %v393_v51 }
 0x1f8   : > { %487 = vst.msk [vmem:[%s974_s3 + $0x8] sm:$0xff] %vm291_vm2, %v483_v53 }
 0x1f9   : > { %486 = vst.msk [vmem:[%s974_s3] sm:$0xff] %vm291_vm2, %v482_v55  ;;  %v621_v58 = vpop.f32.mrb[2].mxu1 }
 0x1fa   : > { %v485_v59 = vadd.f32 %v621_v58, %v396_v56  ;;  %v473_v60 = vpop.f32.mrb[3].mxu1 }
 0x1fb   : > { %v484_v61 = vadd.f32 %v473_v60, %v395_v57 }
 0x1fc   : > { %489 = vst.msk [vmem:[%s974_s3 + $0x18] sm:$0xff] %vm291_vm2, %v485_v59 }
 0x1fd   : > { %488 = vst.msk [vmem:[%s974_s3 + $0x10] sm:$0xff] %vm291_vm2, %v484_v61 }
 0x1fe PF: > { %s15_s21 = sadd.s32 1, %s752_s21   ;;  %s976_s15 = smov %s732_s16 }
 0x1ff   : > { %p12_p13 = scmp.ge.s32.totalorder %s15_s21, 6   ;;  %s977_s16 = smov %s832_s28 }
 0x200   : > { %s978_s17 = smov %s744_s19  ;;  %s979_s18 = smov %s748_s20 }
 0x201   : > { %s980_s19 = smov %s983_s22  ;;  %s981_s20 = smov %s987_s23 }
 0x202   :  { %14 = sbr.rel (!%p12_p13) target bundleno = 4 (0x4), region = 113 }

// kernel: residual_block_pallas.5
= control target key start
LH: loop header
LB: loop body
LE: loop exit
PB: predicated region body
PF: predicated region fallthrough
CT: control target
= control target key end

     0   :  { %11 = vsyncpa [#allocation4], 0  ;;  %s1249_s0 = inlined_call_operand.vmem [shape: f32[2,32,256], index: 0, kind: input, shape index: {}]   ;;  %s1250_s1 = inlined_call_operand.vmem [shape: f32[32,32], index: 1, kind: input, shape index: {}]   ;;  %s1251_s2 = inlined_call_operand.vmem [shape: f32[32,1], index: 2, kind: input, shape index: {}]   ;;  %s1252_s3 = inlined_call_operand.vmem [shape: f32[16,32], index: 3, kind: input, shape index: {}]   ;;  %s1253_s4 = inlined_call_operand.vmem [shape: f32[16,32], index: 4, kind: input, shape index: {}]   ;;  %s1254_s5 = inlined_call_operand.vmem [shape: f32[16,1], index: 5, kind: input, shape index: {}]   ;;  %s1255_s6 = inlined_call_operand.hbm [shape: f32[2,16,256], index: 6, kind: output, shape index: {}]  }
   0x1   :  { %13 = vsyncpa [#allocation4 + $0x1], 0  ;;  %s1048_s21 = smov 0   ;;  %s1050_s22 = smov 0  }
   0x2   :  { %s1052_s23 = smov 0   ;;  %s1054_s24 = smov 0  }
   0x3   :  { %s1056_s25 = smov 0   ;;  %s1058_s26 = smov 0  }
   0x4   :  { %s1060_s27 = smov 0   ;;  %s1062_s28 = smov 0  }
   0x5 LB: > { %s730_s29 = sadd.s32 4294967295, %s1006_s28   ;;  %s731_s30 = sadd.s32 4294967294, %s1006_s28   ;;  %s1006_s28 = sphi %s1062_s28, %s19_s28   ;;  %s1002_s27 = sphi %s1060_s27, %s1265_s27   ;;  %s998_s26 = sphi %s1058_s26, %s1264_s26   ;;  %s994_s25 = sphi %s1056_s25, %s1263_s25   ;;  %s990_s24 = sphi %s1054_s24, %s1262_s24   ;;  %s986_s23 = sphi %s1052_s23, %s1261_s23   ;;  %s982_s22 = sphi %s1050_s22, %s1260_s22   ;;  %s978_s21 = sphi %s1048_s21, %s1259_s21  }
   0x6   : > { %s28_s7 = sadd.s32 1, %s998_s26  ;;  %s31_s8 = sadd.s32 1, %s1002_s27 }
   0x7   : > { %p29_p0 = scmp.ge.s32.totalorder %s28_s7, 2  ;;  %p47_p1 = scmp.ne.s32.totalorder %s986_s23, %s982_s22 }
   0x8   : > { %p48_p2 = scmp.eq.s32.totalorder %s1006_s28, 0  ;;  %p184_p5 = scmp.eq.s32.totalorder %s730_s29, 3 }
   0x9   : > { %s1267_s7 = smov (%p29_p0, %s28_s7), 0  ;;  %s1269_s8 = smov (!%p29_p0, %s31_s8), %s1002_s27 }
   0xa   : > { %s36_s9 = ssub.s32 %s998_s26, %s1267_s7  ;;  %p1100_p3 = por %p48_p2, %p47_p1 }
   0xb   : > { %p33_p4 = scmp.ge.s32.totalorder %s1269_s8, 2  ;;  %p189_p6 = scmp.ne.s32.totalorder %s982_s22, %s978_s21 }
   0xc   : > { %p190_p7 = scmp.eq.s32.totalorder %s731_s30, 3  ;;  %p1108_p8 = por %p184_p5, %p47_p1 }
   0xd   : > { %s1271_s8 = smov (%p33_p4, %s1269_s8), 0  ;;  %s40_s15 = sadd.s32 1, %s986_s23 }
   0xe   : > { %p1112_p9 = por %p190_p7, %p189_p6  ;;  %s35_s13 = ssub.s32 %s1002_s27, %s1271_s8 }
   0xf   : > { %s37_s14 = sor.u32 %s36_s9, %s35_s13  ;;  %p733_p11 = scmp.ge.s32.totalorder %s1006_s28, 4 }
  0x10   : > { %p38_p10 = scmp.eq.s32.totalorder %s37_s14, 0 }
  0x11   : > { %221 = sbr.rel (%p733_p11) target bundleno = 32 (0x20), region = 36 }
  0x12   : > { %s1120_s16 = scalar_select %p38_p10, %s986_s23, %s40_s15  }
  0x18   : > { %224 = sbr.rel (!%p1100_p3) target bundleno = 32 (0x20), region = 40  ;;  %s226_s17 = sand.u32 (%p1100_p3), 1, %s986_s23  }
  0x19   : > { %s735_s18 = sshll.u32 (%p1100_p3), %s1002_s27, 3  ;;  %s734_s19 = sshll.u32 (%p1100_p3), %s226_s17, 5 }
  0x1a   : > { %s230_s20 = sadd.s32 (%p1100_p3), %s998_s26, %s735_s18  ;;  %s228_s14 = scalar_lea.vmem (%p1100_p3), [#allocation2], %s734_s19 }
  0x1b   : > { %s736_s29 = sshll.u32 (%p1100_p3), %s230_s20, 3 }
  0x1c   : > { %s232_s13 = scalar_lea.vmem (%p1100_p3), %s1249_s0, %s736_s29 }
  0x1d   : > { %v266_v0 = vld [vmem:[%s232_s13] sm:$0xff] (%p1100_p3)  ;;  %v268_v1 = vld [vmem:[%s232_s13 + $0x10] sm:$0xff] (%p1100_p3) }
  0x1e   : > { %v270_v2 = vld [vmem:[%s232_s13 + $0x20] sm:$0xff] (%p1100_p3)  ;;  %267 = vst [vmem:[%s228_s14] sm:$0xff] (%p1100_p3), %v266_v0  ;;  %269 = vst [vmem:[%s228_s14 + $0x8] sm:$0xff] (%p1100_p3), %v268_v1  ;;  %v272_v3 = vld [vmem:[%s232_s13 + $0x30] sm:$0xff] (%p1100_p3) }
  0x1f   : > { %271 = vst [vmem:[%s228_s14 + $0x10] sm:$0xff] %v270_v2  ;;  %273 = vst [vmem:[%s228_s14 + $0x18] sm:$0xff] %v272_v3 }
  0x20 PF: > { %p737_p12 = scmp.ge.s32.totalorder %s1006_s28, 1  ;;  %p278_p13 = scmp.lt.s32.totalorder %s1006_s28, 5 }
  0x22   : > { %p279_p0 = pnand %p737_p12, %p278_p13 }
  0x23   : > { %s1134_s10 = sand.u32 (!%p279_p0), 1, %s982_s22   ;;  %v318_v4 = vld [vmem:[%s1250_s1] sm:$0xff] (!%p279_p0)  ;;  %vm346_vm0 = vcmask (!%p279_p0), 261120   ;;  %v1008_v5 = vmov (!%p279_p0), 0   ;;  %v324_v7 = vld [vmem:[%s1251_s2 + $0x10] sm:$0xff] (!%p279_p0)  ;;  %v323_v8 = vld [vmem:[%s1251_s2 + $0x8] sm:$0xff] (!%p279_p0) }
  0x24   : > { %282 = sbr.rel (%p279_p0) target bundleno = 509 (0x1fd), region = 78  ;;  %s738_s18 = sshll.u32 (!%p279_p0), %s1134_s10, 5  ;;  %781 = vmatprep.mubr.msk.f32.mxu0 (!%p279_p0), %vm346_vm0, %v318_v4  ;;  %910 = vset.pattern.permute.xlu0 (!%p279_p0), %v1008_v5  ;;  %v322_v6 = vld [vmem:[%s1251_s2] sm:$0xff] (!%p279_p0)  ;;  %v325_v14 = vld [vmem:[%s1251_s2 + $0x18] sm:$0xff] (!%p279_p0)  ;;  %v615_v17 = vld [vmem:[%s1254_s5 + $0x8] sm:$0xff] (!%p279_p0) }
  0x25   : > { %328 = vperm.xlu0 (!%p279_p0), %910, %v322_v6   ;;  %911 = vset.pattern.permute.xlu1 (!%p279_p0), %v1008_v5  ;;  %s287_s14 = scalar_lea.vmem (!%p279_p0), [#allocation2], %s738_s18  ;;  %v614_v16 = vld [vmem:[%s1254_s5] sm:$0xff] (!%p279_p0)  ;;  %v319_v18 = vld [vmem:[%s1250_s1 + $0x8] sm:$0xff] (!%p279_p0)  ;;  %v320_v19 = vld [vmem:[%s1250_s1 + $0x10] sm:$0xff] (!%p279_p0)  ;;  %s739_s15 = sshll.u32 (!%p279_p0), %s1134_s10, 4 }
  0x26   : > { %v314_v9 = vld [vmem:[%s287_s14] sm:$0xff] (!%p279_p0)  ;;  %v315_v10 = vld [vmem:[%s287_s14 + $0x8] sm:$0xff] (!%p279_p0)  ;;  %v316_v11 = vld [vmem:[%s287_s14 + $0x10] sm:$0xff] (!%p279_p0)  ;;  %338 = vperm.xlu1 (!%p279_p0), %911, %v324_v7   ;;  %s749_s17 = sshll.u32 (!%p279_p0), %s994_s25, 2  ;;  %s313_s20 = scalar_lea.vmem (!%p279_p0), [#allocation3], %s739_s15 }
  0x27   : > { %v809_v12 = vpack.c.bf16 (!%p279_p0), %v315_v10, %v314_v9  ;;  %v317_v13 = vld [vmem:[%s287_s14 + $0x18] sm:$0xff] (!%p279_p0)  ;;  %v450_v21 = vld [vmem:[%s1253_s4] sm:$0xff] (!%p279_p0)  ;;  %v451_v22 = vld [vmem:[%s1253_s4 + $0x8] sm:$0xff] (!%p279_p0)  ;;  %s644_s19 = sadd.s32 (!%p279_p0), %s990_s24, %s749_s17  ;;  %s647_s18 = sshll.u32 (!%p279_p0), %s313_s20, 4  ;;  %s1190_s18 = int_to_ptr.vmem [resolvable:$true] %s647_s18 }
  0x28   : > { %v813_v15 = vpack.c.bf16 (!%p279_p0), %v317_v13, %v316_v11  ;;  %v321_v20 = vld [vmem:[%s1250_s1 + $0x18] sm:$0xff] (!%p279_p0)  ;;  %795 = vmatprep.mubr.msk.f32.mxu1 (!%p279_p0), %vm346_vm0, %v450_v21  ;;  %v448_v23 = vld [vmem:[%s1252_s3] sm:$0xff] (!%p279_p0)  ;;  %v449_v42 = vld [vmem:[%s1252_s3 + $0x8] sm:$0xff] (!%p279_p0)  ;;  %s750_s29 = sshll.u32 (!%p279_p0), %s644_s19, 7  ;;  %s633_s9 = scalar_lea.sflag (!%p279_p0), [#allocation4], %s1134_s10 }
  0x29   : > { %810 = vmatprep.subr.bf16.mxu0 (!%p279_p0), %v809_v12  ;;  %333 = vperm.xlu0 (!%p279_p0), %910, %v323_v8   ;;  %s1195_s24 = scalar_lea.hbm (!%p279_p0), %s1255_s6, %s750_s29  ;;  %s912_s13 = scalar_lea.vmem (!%p279_p0), %s1190_s18, 256 }
  0x2a   : > { %812 = vmatpush3.bf16.msra.mxu0 (!%p279_p0), %v809_v12  ;;  %343 = vperm.xlu1 (!%p279_p0), %911, %v325_v14   ;;  %p913_p1 = scmp.ne.s32.totalorder (!%p279_p0), %s1190_s18, %s912_s13  ;;  %s1009_s14 = smov (!%p279_p0), [#allocation3]  }
  0x2b   : > { %814 = vmatprep.subr.bf16.mxu0 %v813_v15  ;;  %818 = vmatprep.subr.bf16.mxu1 %v809_v12  ;;  %s916_s15 = sshll.u32 %s1009_s14, 4  ;;  %s917_s15 = int_to_ptr.vmem [resolvable:$false] %s916_s15 }
  0x2c   : > { %820 = vmatpush3.bf16.msra.mxu1 %v809_v12  ;;  %p914_p2 = pnand %p913_p1, %p1108_p8  ;;  %s918_s17 = scalar_lea.vmem %s917_s15, 512 }
  0x2d   : > { %618 = vperm.xlu0 %910, %v614_v16   ;;  %822 = vmatprep.subr.bf16.mxu1 %v813_v15  ;;  %p919_p4 = scmp.lt.s32.totalorder %s1190_s18, %s917_s15  ;;  %p920_p5 = scmp.lt.s32.totalorder %s918_s17, %s912_s13 }
  0x2e   : > { %816 = vmatpush3.bf16.msra.mxu0 %v813_v15  ;;  %623 = vperm.xlu1 %911, %v615_v17   ;;  %p915_p3 = pneg %p914_p2 }
  0x2f   : > { %p921_p6 = por %p920_p5, %p919_p4 }
  0x30   : > { %824 = vmatpush3.bf16.msra.mxu1 %v813_v15 }
  0x31   : > { %782 = vmatmul.mubr.msk.f32.vlgmr.msra.gmra.mrb[0].mxu0 %vm346_vm0, %v319_v18  ;;  %p922_p7 = pnand %p921_p6, %p915_p3 }
  0x32   : > { %784 = vmatprep.mubr.msk.f32.mxu0 %vm346_vm0, %v320_v19 }
  0x33   : > { %796 = vmatmul.mubr.msk.f32.vlgmr.msra.gmra.mrb[0].mxu1 %vm346_vm0, %v451_v22 }
  0x34   : > { %806 = vmatprep.mubr.msk.f32.mxu1 %vm346_vm0, %v448_v23 }
  0x35   : > { %785 = vmatmul.mubr.msk.f32.gmra.mrb[2].mxu0 %vm346_vm0, %v321_v20 }
  0xa4   : > { %v329_v24 = vpop.permute.xlu0 %328 }
  0xa5   : > { %v339_v25 = vpop.permute.xlu1 %338 }
  0xa8   : > { %v334_v26 = vpop.permute.xlu0 %333 }
  0xa9   : > { %v344_v32 = vpop.permute.xlu1 %343 }
  0xac   : > { %v619_v45 = vpop.permute.xlu0 %618 }
  0xad   : > { %v624_v43 = vpop.permute.xlu1 %623 }
 0x104   : > { %v783_v27 = vpop.f32.mrb[0].mxu0 }
 0x105   : > { %v431_v28 = vadd.f32 %v783_v27, %v334_v26  ;;  %v425_v29 = vpop.f32.mrb[1].mxu0 }
 0x106   : > { %v426_v30 = vadd.f32 %v425_v29, %v329_v24 }
 0x107   : > { %v445_v31 = vmax.f32 %v431_v28, 0.0 }
 0x108   : > { %v444_v33 = vmax.f32 %v426_v30, 0.0  ;;  %v786_v34 = vpop.f32.mrb[2].mxu0 }
 0x109   : > { %v441_v35 = vadd.f32 %v786_v34, %v344_v32  ;;  %v435_v36 = vpop.f32.mrb[3].mxu0 }
 0x10a   : > { %v825_v37 = vpack.c.bf16 %v445_v31, %v444_v33  ;;  %v436_v38 = vadd.f32 %v435_v36, %v339_v25 }
 0x10b   : > { %v447_v39 = vmax.f32 %v441_v35, 0.0 }
 0x10c   : > { %v446_v40 = vmax.f32 %v436_v38, 0.0  ;;  %826 = vmatprep.subr.bf16.mxu1 %v825_v37 }
 0x10d   : > { %828 = vmatpush3.bf16.msra.mxu1 %v825_v37 }
 0x10e   : > { %v829_v41 = vpack.c.bf16 %v447_v39, %v446_v40 }
 0x110   : > { %830 = vmatprep.subr.bf16.mxu1 %v829_v41 }
 0x111   : > { %832 = vmatpush3.bf16.msra.mxu1 %v829_v41 }
 0x114   : > { %807 = vmatmul.mubr.msk.f32.vlgmr.msra.gmra.mrb[0].mxu1 %vm346_vm0, %v449_v42 }
 0x1e7   : > { %v808_v44 = vpop.f32.mrb[0].mxu1 }
 0x1e8   : > { %v627_v46 = vadd.f32 %v808_v44, %v624_v43  ;;  %v605_v47 = vpop.f32.mrb[1].mxu1 }
 0x1e9   : > { %v626_v48 = vadd.f32 %v619_v45, %v605_v47 }
 0x1ea   : > { %v629_v49 = vmax.f32 %v627_v46, 0.0 }
 0x1eb   : > { %v628_v50 = vmax.f32 %v626_v48, 0.0 }
 0x1ec   : > { %631 = vst [vmem:[%s313_s20 + $0x8] sm:$0xff] %v629_v49 }
 0x1ed   : > { %630 = vst [vmem:[%s313_s20] sm:$0xff] %v628_v50 }
 0x1ee   : > { %925 = shalt.err (!%p922_p7)
}
 0x1ef   : > { %s926_s19 = scalar_lea.hbm %s1195_s24, 256  ;;  %s930_s30 = scalar_lea.hbm %s1255_s6, 1024 }
 0x1f0   : > { %p927_p10 = scmp.ne.s32.totalorder %s1195_s24, %s926_s19  ;;  %p931_p13 = scmp.lt.u32.totalorder %s1195_s24, %s1255_s6 }
 0x1f1   : > { %p932_p0 = scmp.lt.u32.totalorder %s930_s30, %s926_s19  ;;  %p934_p2 = scmp.lt.u32.totalorder %s926_s19, %s1195_s24 }
 0x1f2   : > { %p928_p11 = pnand %p927_p10, %p1108_p8 }
 0x1f3   : > { %p933_p1 = por %p932_p0, %p931_p13 }
 0x1f4   : > { %p929_p12 = pneg %p928_p11 }
 0x1f5   : > { %p935_p3 = por %p934_p2, %p933_p1 }
 0x1f7   : > { %p936_p4 = pnand %p935_p3, %p929_p12 }
 0x1f9   : > { %939 = shalt.err (!%p936_p4)
}
 0x1fa   : > { %s1010_s13 = smov 128   ;;  %s1011_s15 = smov 256  }
 0x1fb   : > { %s1012_s17 = smov 8  }
 0x1fc   : > { %835 = dma.vmem_to_hbm [thread:$0]  (%p1108_p8), %s1190_s18, 256, %s1195_s24, %s633_s9, %s1010_s13, %s1011_s15, %s1012_s17  }
 0x1fd PF: > { %p841_p5 = scmp.ge.s32.totalorder %s1006_s28, 2  ;;  %s662_s20 = sand.u32 1, %s978_s21  }
 0x1fe   : > { %s663_s19 = scalar_lea.sflag [#allocation4], %s662_s20 }
 0x1ff   : > { %p838_p6 = pnand %p841_p5, %p1112_p9 }
 0x201   : > { %973 = dma.done.wait (!%p838_p6), %s663_s19, 256  }
 0x202   : > { %975 = vsyncadd (!%p838_p6), %s663_s19, 4294967040  ;;  %s19_s28 = sadd.s32 1, %s1006_s28   ;;  %s1259_s21 = smov %s982_s22 }
 0x203   : > { %p16_p7 = scmp.ge.s32.totalorder %s19_s28, 6   ;;  %s1260_s22 = smov %s986_s23 }
 0x204   : > { %s1261_s23 = smov %s1120_s16  ;;  %s1262_s24 = smov %s998_s26 }
 0x205   : > { %s1263_s25 = smov %s1002_s27  ;;  %s1264_s26 = smov %s1267_s7 }
 0x206   : > { %s1265_s27 = smov %s1271_s8  ;;  %18 = sbr.rel (!%p16_p7) target bundleno = 5 (0x5), region = 122 }
 0x20d   :  { %668 = vsyncpa [#allocation4], 1 }
 0x20e   :  { %670 = vsyncpa [#allocation4 + $0x1], 1 }

</bundles_post_ra>
